<compile_context>
chip_gen: v7x
topology: tpu7x:2x2x1
jax: 0.10.0
libtpu: 0.0.40
codegen_flags: <defaults>
</compile_context>

<pallas_src>
import jax
import jax.numpy as jnp
from jax.experimental import pallas as pl
from jax.experimental.pallas import tpu as pltpu


# --------------------------------- kernel ----------------------------------

def adaptive_identity_kernel(a_ref, b_ref, w1_ref, b1_ref, w2_ref, b2_ref,
                             out_ref):
    # a_ref / b_ref / out_ref : (rows, D)
    # w1_ref / w2_ref         : (D, D)   (already transposed: x @ W + b)
    # b1_ref / b2_ref         : (1, D)
    a = a_ref[...]
    h = jnp.dot(a, w1_ref[...], preferred_element_type=jnp.float32) + b1_ref[...]
    logits = jnp.dot(h, w2_ref[...], preferred_element_type=jnp.float32) + b2_ref[...]
    mask = jax.nn.sigmoid(logits)
    out_ref[...] = a * mask + b_ref[...] * (1.0 - mask)


# -------------------------------- wrapper -----------------------------------

def _pick_row_tile(n):
    """Largest row tile (multiple of 8) that divides n, or None."""
    if n % 8 != 0:
        return None
    for tm in (256, 128, 64, 32, 16, 8):
        if n % tm == 0:
            return tm
    return None


def adaptive_identity(embedding_face_a, embedding_face_b, w1, b1, w2, b2):
    """embedding_face_a / _b: (N, D) f32; w1, w2: (D, D); b1, b2: (1, D)."""
    n, d = embedding_face_a.shape
    out_shape = jax.ShapeDtypeStruct((n, d), jnp.float32)

    tm = _pick_row_tile(n)
    if tm is None or n == tm:
        # Small batch: single invocation, full arrays resident in VMEM.
        return pl.pallas_call(
            adaptive_identity_kernel,
            out_shape=out_shape,
        )(embedding_face_a, embedding_face_b, w1, b1, w2, b2)

    # Larger batch: tile rows, batch axis is independent -> "parallel"
    # (uses both TensorCores on v7x; neutral on v5e/v6e).
    row_spec = pl.BlockSpec((tm, d), lambda i: (i, 0))
    w_spec = pl.BlockSpec((d, d), lambda i: (0, 0))
    bias_spec = pl.BlockSpec((1, d), lambda i: (0, 0))
    return pl.pallas_call(
        adaptive_identity_kernel,
        out_shape=out_shape,
        grid=(n // tm,),
        in_specs=[row_spec, row_spec, w_spec, bias_spec, w_spec, bias_spec],
        out_specs=row_spec,
        compiler_params=pltpu.CompilerParams(
            dimension_semantics=("parallel",)),
    )(embedding_face_a, embedding_face_b, w1, b1, w2, b2)


# ----------------------------- params / reference ---------------------------

def init_params(key, dim, scale=0.05):
    k1, k2, k3, k4 = jax.random.split(key, 4)
    # Stored pre-transposed: Linear(x) = x @ w + b  (w is (in, out)).
    return {
        "w1": scale * jax.random.normal(k1, (dim, dim), dtype=jnp.float32),
        "b1": scale * jax.random.normal(k2, (1, dim), dtype=jnp.float32),
        "w2": scale * jax.random.normal(k3, (dim, dim), dtype=jnp.float32),
        "b2": scale * jax.random.normal(k4, (1, dim), dtype=jnp.float32),
    }


def reference_forward(params, a, b):
    h = a @ params["w1"] + params["b1"]
    mask = jax.nn.sigmoid(h @ params["w2"] + params["b2"])
    return a * mask + b * (1.0 - mask)


# ----------------------------------- main ------------------------------------

if __name__ == "__main__":
    N, DIM = 2, 128  # lane-dense embedding dim

    key = jax.random.PRNGKey(0)
    k_a, k_b, k_p = jax.random.split(key, 3)
    emb_a = jax.random.normal(k_a, (N, DIM), dtype=jnp.float32)
    emb_b = jax.random.normal(k_b, (N, DIM), dtype=jnp.float32)
    params = init_params(k_p, DIM)

    out = adaptive_identity(emb_a, emb_b,
                            params["w1"], params["b1"],
                            params["w2"], params["b2"])
    out = jax.block_until_ready(out)

    assert out.shape == (N, DIM), out.shape
    assert bool(jnp.all(jnp.isfinite(out)))

    ref = reference_forward(params, emb_a, emb_b)
    assert bool(jnp.allclose(out, ref, atol=1e-5, rtol=1e-5))

    print("KERNEL_OK")
</pallas_src>

<mosaic_0001>
module attributes {stable_mosaic.version = 11 : i64} {
  func.func @adaptive_identity_kernel(%arg0: memref<2x128xf32, #tpu.memory_space<vmem>>, %arg1: memref<2x128xf32, #tpu.memory_space<vmem>>, %arg2: memref<128x128xf32, #tpu.memory_space<vmem>>, %arg3: memref<1x128xf32, #tpu.memory_space<vmem>>, %arg4: memref<128x128xf32, #tpu.memory_space<vmem>>, %arg5: memref<1x128xf32, #tpu.memory_space<vmem>>, %arg6: memref<2x128xf32, #tpu.memory_space<vmem>>) attributes {dimension_semantics = [], scalar_prefetch = 0 : i64, scratch_operands = 0 : i64, tpu.core_type = #tpu.core_type<tc>} {
    %c0 = arith.constant 0 : index
    %c0_0 = arith.constant 0 : index
    %0 = vector.load %arg0[%c0, %c0_0] : memref<2x128xf32, #tpu.memory_space<vmem>>, vector<2x128xf32>
    %c0_1 = arith.constant 0 : index
    %c0_2 = arith.constant 0 : index
    %1 = vector.load %arg2[%c0_1, %c0_2] : memref<128x128xf32, #tpu.memory_space<vmem>>, vector<128x128xf32>
    %cst = arith.constant dense<0.000000e+00> : vector<2x128xf32>
    %2 = tpu.matmul %0, %1, %cst {dimension_numbers = #tpu.dot_dimension_numbers<[1], [0], [0], [1], [0, 0, 1, 1], [], []>} : vector<2x128xf32>, vector<128x128xf32>, vector<2x128xf32> -> vector<2x128xf32>
    %c0_3 = arith.constant 0 : index
    %c0_4 = arith.constant 0 : index
    %3 = vector.load %arg3[%c0_3, %c0_4] : memref<1x128xf32, #tpu.memory_space<vmem>>, vector<1x128xf32>
    %4 = vector.broadcast %3 : vector<1x128xf32> to vector<2x128xf32>
    %5 = arith.addf %2, %4 : vector<2x128xf32>
    %c0_5 = arith.constant 0 : index
    %c0_6 = arith.constant 0 : index
    %6 = vector.load %arg4[%c0_5, %c0_6] : memref<128x128xf32, #tpu.memory_space<vmem>>, vector<128x128xf32>
    %cst_7 = arith.constant dense<0.000000e+00> : vector<2x128xf32>
    %7 = tpu.matmul %5, %6, %cst_7 {dimension_numbers = #tpu.dot_dimension_numbers<[1], [0], [0], [1], [0, 0, 1, 1], [], []>} : vector<2x128xf32>, vector<128x128xf32>, vector<2x128xf32> -> vector<2x128xf32>
    %c0_8 = arith.constant 0 : index
    %c0_9 = arith.constant 0 : index
    %8 = vector.load %arg5[%c0_8, %c0_9] : memref<1x128xf32, #tpu.memory_space<vmem>>, vector<1x128xf32>
    %9 = vector.broadcast %8 : vector<1x128xf32> to vector<2x128xf32>
    %10 = arith.addf %7, %9 : vector<2x128xf32>
    %11 = arith.negf %10 : vector<2x128xf32>
    %12 = math.exp %11 : vector<2x128xf32>
    %cst_10 = arith.constant 1.000000e+00 : f32
    %13 = vector.broadcast %cst_10 : f32 to vector<2x128xf32>
    %14 = arith.addf %13, %12 : vector<2x128xf32>
    %15 = arith.divf %13, %14 : vector<2x128xf32>
    %16 = arith.mulf %0, %15 : vector<2x128xf32>
    %c0_11 = arith.constant 0 : index
    %c0_12 = arith.constant 0 : index
    %17 = vector.load %arg1[%c0_11, %c0_12] : memref<2x128xf32, #tpu.memory_space<vmem>>, vector<2x128xf32>
    %cst_13 = arith.constant 1.000000e+00 : f32
    %18 = vector.broadcast %cst_13 : f32 to vector<2x128xf32>
    %19 = arith.subf %18, %15 : vector<2x128xf32>
    %20 = arith.mulf %17, %19 : vector<2x128xf32>
    %21 = arith.addf %16, %20 : vector<2x128xf32>
    %c0_14 = arith.constant 0 : index
    %c0_15 = arith.constant 0 : index
    %22 = vector.load %arg6[%c0_14, %c0_15] : memref<2x128xf32, #tpu.memory_space<vmem>>, vector<2x128xf32>
    tpu.vector_store %arg6[%c0_14, %c0_15], %21 {strides = array<i32>} : memref<2x128xf32, #tpu.memory_space<vmem>>, vector<2x128xf32>,
    return
  }
}

</mosaic_0001>

<bundles_post_ra>
// kernel: tpu_custom_call.1
= control target key start
LH: loop header
LB: loop body
LE: loop exit
PB: predicated region body
PF: predicated region fallthrough
CT: control target
= control target key end

     0   :  { %11 = vsyncpa [#allocation3], 0  ;;  %s663_s0 = inlined_call_operand.hbm [shape: f32[2,128], index: 0, kind: input, shape index: {}]   ;;  %s664_s1 = inlined_call_operand.vmem [shape: f32[2,128], index: 1, kind: input, shape index: {}]   ;;  %s665_s2 = inlined_call_operand.hbm [shape: f32[128,128], index: 2, kind: input, shape index: {}]   ;;  %s666_s3 = inlined_call_operand.vmem [shape: f32[1,128], index: 3, kind: input, shape index: {}]   ;;  %s667_s4 = inlined_call_operand.hbm [shape: f32[128,128], index: 4, kind: input, shape index: {}]   ;;  %s668_s5 = inlined_call_operand.vmem [shape: f32[1,128], index: 5, kind: input, shape index: {}]   ;;  %s669_s6 = inlined_call_operand.hbm [shape: f32[2,128], index: 6, kind: output, shape index: {}]  }
   0x1   :  { %12 = vsyncpa [#allocation6], 0 }
   0x2   :  { %13 = vsyncpa [#allocation4], 0  ;;  %s540_s21 = smov [#allocation5]   ;;  %s446_s25 = scalar_lea.hbm %s665_s2, 2048 }
   0x3   :  { %s31_s22 = sshll.u32 %s540_s21, 4  ;;  %p447_p0 = scmp.ne.s32.totalorder %s665_s2, %s446_s25  ;;  %s32_s22 = int_to_ptr.vmem [resolvable:$true] %s31_s22 }
   0x4   :  { %p450_p1 = scmp.lt.u32.totalorder %s446_s25, %s665_s2 }
   0x6   :  { %p452_p2 = pnand %p450_p1, %p447_p0 }
   0x8   :  { %455 = shalt.err (!%p452_p2)
}
   0x9   :  { %s456_s30 = scalar_lea.vmem %s32_s22, 2048  ;;  %p461_p4 = scmp.lt.s32.totalorder %s32_s22, %s32_s22 }
   0xa   :  { %p457_p3 = scmp.ne.s32.totalorder %s32_s22, %s456_s30  ;;  %p462_p5 = scmp.lt.s32.totalorder %s456_s30, %s456_s30 }
   0xc   :  { %p463_p6 = por %p462_p5, %p461_p4 }
   0xe   :  { %p464_p7 = pnand %p463_p6, %p457_p3 }
  0x10   :  { %467 = shalt.err (!%p464_p7)
}
  0x11   :  { %s541_s7 = smov 128   ;;  %s542_s8 = smov 8  }
  0x12   :  { %37 = dma.hbm_to_vmem [thread:$0]  %s665_s2, 2048, %s32_s22, [#allocation6], %s541_s7, %s541_s7, %s542_s8  }
  0x13   :  { %s543_s11 = smov [#allocation2]   ;;  %s544_s13 = smov [#allocation7]  }
  0x14   :  { %s20_s12 = sshll.u32 %s543_s11, 4  ;;  %s45_s14 = sshll.u32 %s544_s13, 4  ;;  %s21_s12 = int_to_ptr.vmem [resolvable:$true] %s20_s12  ;;  %s46_s14 = int_to_ptr.vmem [resolvable:$true] %s45_s14 }
  0x15   :  { %s468_s17 = scalar_lea.hbm %s663_s0, 32 }
  0x16   :  { %p469_p8 = scmp.ne.s32.totalorder %s663_s0, %s468_s17  ;;  %p472_p9 = scmp.lt.u32.totalorder %s468_s17, %s663_s0 }
  0x18   :  { %p474_p10 = pnand %p472_p9, %p469_p8 }
  0x1a   :  { %477 = shalt.err (!%p474_p10)
}
  0x1b   :  { %s478_s2 = scalar_lea.vmem %s21_s12, 32  ;;  %p483_p12 = scmp.lt.s32.totalorder %s21_s12, %s21_s12 }
  0x1c   :  { %p479_p11 = scmp.ne.s32.totalorder %s21_s12, %s478_s2  ;;  %p484_p13 = scmp.lt.s32.totalorder %s478_s2, %s478_s2 }
  0x1e   :  { %p485_p0 = por %p484_p13, %p483_p12 }
  0x20   :  { %p486_p1 = pnand %p485_p0, %p479_p11 }
  0x22   :  { %489 = shalt.err (!%p486_p1)
}
  0x23   :  { %23 = dma.hbm_to_vmem [thread:$0]  %s663_s0, 32, %s21_s12, [#allocation3]  }
  0x24   :  { %s490_s26 = scalar_lea.hbm %s667_s4, 2048 }
  0x25   :  { %p491_p2 = scmp.ne.s32.totalorder %s667_s4, %s490_s26  ;;  %p494_p3 = scmp.lt.u32.totalorder %s490_s26, %s667_s4 }
  0x27   :  { %p496_p4 = pnand %p494_p3, %p491_p2 }
  0x29   :  { %499 = shalt.err (!%p496_p4)
}
  0x2a   :  { %s500_s9 = scalar_lea.vmem %s46_s14, 2048  ;;  %p505_p6 = scmp.lt.s32.totalorder %s46_s14, %s46_s14 }
  0x2b   :  { %p501_p5 = scmp.ne.s32.totalorder %s46_s14, %s500_s9  ;;  %p506_p7 = scmp.lt.s32.totalorder %s500_s9, %s500_s9 }
  0x2d   :  { %p507_p8 = por %p506_p7, %p505_p6 }
  0x2f   :  { %p508_p9 = pnand %p507_p8, %p501_p5 }
  0x31   :  { %511 = shalt.err (!%p508_p9)
}
  0x32   :  { %51 = dma.hbm_to_vmem [thread:$0]  %s667_s4, 2048, %s46_s14, [#allocation6], %s541_s7, %s541_s7, %s542_s8  }
  0x33   :  { %534 = dma.done.wait [#allocation3], 32  }
  0x34   :  { %535 = vsyncadd [#allocation3], 4294967264 }
  0x35   :  { %536 = dma.done.wait [#allocation6], 4096  }
  0x36   :  { %537 = vsyncadd [#allocation6], 4294963200  ;;  %v545_v0 = vmov 0.0|0.0   ;;  %vm546_vm0 = vmmov 0   ;;  %v547_v1 = vmov 0.0   ;;  %v64_v2 = vld [vmem:[#allocation5] sm:$0xff] }
  0x37   :  { %385 = vmatprep.subr.bf16.mxu0 %v545_v0  ;;  %347 = vmatprep.mubr.msk.f32.mxu0 %vm546_vm0, %v547_v1  ;;  %v65_v3 = vld [vmem:[#allocation5 + $0x8] sm:$0xff]  ;;  %v66_v4 = vld [vmem:[#allocation5 + $0x10] sm:$0xff]  ;;  %v67_v6 = vld [vmem:[#allocation5 + $0x18] sm:$0xff] }
  0x38   :  { %409 = vmatprep.subr.bf16.mxu1 %v545_v0  ;;  %382 = vmatprep.mubr.msk.f32.mxu1 %vm546_vm0, %v547_v1  ;;  %v386_v5 = vpack.c.bf16 %v65_v3, %v64_v2  ;;  %v389_v7 = vpack.c.bf16 %v67_v6, %v66_v4  ;;  %v68_v8 = vld [vmem:[#allocation5 + $0x20] sm:$0xff]  ;;  %v69_v9 = vld [vmem:[#allocation5 + $0x28] sm:$0xff]  ;;  %v159_v12 = vld [vmem:[#allocation7 + $0x10] sm:$0xff] }
  0x39   :  { %v157_v10 = vld [vmem:[#allocation7] sm:$0xff]  ;;  %v158_v11 = vld [vmem:[#allocation7 + $0x8] sm:$0xff]  ;;  %v160_v13 = vld [vmem:[#allocation7 + $0x18] sm:$0xff]  ;;  %v392_v14 = vpack.c.bf16 %v69_v9, %v68_v8 }
  0x3a   :  { %387 = vmatpush3.bf16.msra.mxu0 %v386_v5  ;;  %v410_v15 = vpack.c.bf16 %v158_v11, %v157_v10  ;;  %v70_v16 = vld [vmem:[#allocation5 + $0x30] sm:$0xff]  ;;  %v71_v17 = vld [vmem:[#allocation5 + $0x38] sm:$0xff]  ;;  %v413_v18 = vpack.c.bf16 %v160_v13, %v159_v12  ;;  %v161_v19 = vld [vmem:[#allocation7 + $0x20] sm:$0xff] }
  0x3b   :  { %388 = vmatprep.subr.bf16.mxu0 %v545_v0  ;;  %v162_v20 = vld [vmem:[#allocation7 + $0x28] sm:$0xff]  ;;  %v395_v21 = vpack.c.bf16 %v71_v17, %v70_v16  ;;  %v72_v22 = vld [vmem:[#allocation5 + $0x40] sm:$0xff]  ;;  %v163_v25 = vld [vmem:[#allocation7 + $0x30] sm:$0xff] }
  0x3c   :  { %411 = vmatpush3.bf16.msra.mxu1 %v410_v15  ;;  %v73_v23 = vld [vmem:[#allocation5 + $0x48] sm:$0xff]  ;;  %v416_v24 = vpack.c.bf16 %v162_v20, %v161_v19  ;;  %v164_v26 = vld [vmem:[#allocation7 + $0x38] sm:$0xff]  ;;  %v74_v28 = vld [vmem:[#allocation5 + $0x50] sm:$0xff] }
  0x3d   :  { %412 = vmatprep.subr.bf16.mxu1 %v545_v0  ;;  %v398_v27 = vpack.c.bf16 %v73_v23, %v72_v22  ;;  %v75_v29 = vld [vmem:[#allocation5 + $0x58] sm:$0xff]  ;;  %v419_v30 = vpack.c.bf16 %v164_v26, %v163_v25  ;;  %v165_v31 = vld [vmem:[#allocation7 + $0x40] sm:$0xff]  ;;  %v166_v32 = vld [vmem:[#allocation7 + $0x48] sm:$0xff] }
  0x3e   :  { %390 = vmatpush3.bf16.msra.mxu0 %v389_v7  ;;  %v401_v33 = vpack.c.bf16 %v75_v29, %v74_v28  ;;  %v76_v34 = vld [vmem:[#allocation5 + $0x60] sm:$0xff]  ;;  %v77_v35 = vld [vmem:[#allocation5 + $0x68] sm:$0xff]  ;;  %v422_v36 = vpack.c.bf16 %v166_v32, %v165_v31  ;;  %v167_v37 = vld [vmem:[#allocation7 + $0x50] sm:$0xff] }
  0x3f   :  { %391 = vmatprep.subr.bf16.mxu0 %v545_v0  ;;  %v168_v38 = vld [vmem:[#allocation7 + $0x58] sm:$0xff]  ;;  %v404_v39 = vpack.c.bf16 %v77_v35, %v76_v34  ;;  %v78_v40 = vld [vmem:[#allocation5 + $0x70] sm:$0xff]  ;;  %v169_v43 = vld [vmem:[#allocation7 + $0x60] sm:$0xff] }
  0x40   :  { %414 = vmatpush3.bf16.msra.mxu1 %v413_v18  ;;  %v79_v41 = vld [vmem:[#allocation5 + $0x78] sm:$0xff]  ;;  %v425_v42 = vpack.c.bf16 %v168_v38, %v167_v37  ;;  %v170_v44 = vld [vmem:[#allocation7 + $0x68] sm:$0xff]  ;;  %v171_v48 = vld [vmem:[#allocation7 + $0x70] sm:$0xff] }
  0x41   :  { %415 = vmatprep.subr.bf16.mxu1 %v545_v0  ;;  %v407_v45 = vpack.c.bf16 %v79_v41, %v78_v40  ;;  %v428_v46 = vpack.c.bf16 %v170_v44, %v169_v43  ;;  %v63_v47 = vld [vmem:[#allocation2] sm:$0x3] }
  0x42   :  { %393 = vmatpush3.bf16.msra.mxu0 %v392_v14  ;;  %v172_v49 = vld [vmem:[#allocation7 + $0x78] sm:$0xff] }
  0x43   :  { %394 = vmatprep.subr.bf16.mxu0 %v545_v0  ;;  %v431_v50 = vpack.c.bf16 %v172_v49, %v171_v48  ;;  %v278_v51 = vld [vmem:[%s666_s3] ss:$0 sm:$0xff]  ;;  %s548_s3 = smov [#allocation8]  }
  0x44   :  { %417 = vmatpush3.bf16.msra.mxu1 %v416_v24  ;;  %v279_v55 = vld [vmem:[%s668_s5] ss:$0 sm:$0xff]  ;;  %s268_s14 = sshll.u32 %s548_s3, 4  ;;  %s269_s14 = int_to_ptr.vmem [resolvable:$true] %s268_s14 }
  0x45   :  { %418 = vmatprep.subr.bf16.mxu1 %v545_v0  ;;  %v257_v63 = vld [vmem:[%s664_s1] sm:$0x3]  ;;  %s512_s5 = scalar_lea.vmem %s269_s14, 32  ;;  %p517_p11 = scmp.lt.s32.totalorder %s269_s14, %s269_s14 }
  0x46   :  { %396 = vmatpush3.bf16.msra.mxu0 %v395_v21  ;;  %p513_p10 = scmp.ne.s32.totalorder %s269_s14, %s512_s5  ;;  %p518_p12 = scmp.lt.s32.totalorder %s512_s5, %s512_s5 }
  0x47   :  { %397 = vmatprep.subr.bf16.mxu0 %v545_v0 }
  0x48   :  { %420 = vmatpush3.bf16.msra.mxu1 %v419_v30  ;;  %p519_p13 = por %p518_p12, %p517_p11 }
  0x49   :  { %421 = vmatprep.subr.bf16.mxu1 %v545_v0 }
  0x4a   :  { %399 = vmatpush3.bf16.msra.mxu0 %v398_v27  ;;  %p520_p0 = pnand %p519_p13, %p513_p10 }
  0x4b   :  { %400 = vmatprep.subr.bf16.mxu0 %v545_v0 }
  0x4c   :  { %423 = vmatpush3.bf16.msra.mxu1 %v422_v36 }
  0x4d   :  { %424 = vmatprep.subr.bf16.mxu1 %v545_v0 }
  0x4e   :  { %402 = vmatpush3.bf16.msra.mxu0 %v401_v33 }
  0x4f   :  { %403 = vmatprep.subr.bf16.mxu0 %v545_v0 }
  0x50   :  { %426 = vmatpush3.bf16.msra.mxu1 %v425_v42 }
  0x51   :  { %427 = vmatprep.subr.bf16.mxu1 %v545_v0 }
  0x52   :  { %405 = vmatpush3.bf16.msra.mxu0 %v404_v39 }
  0x53   :  { %406 = vmatprep.subr.bf16.mxu0 %v545_v0 }
  0x54   :  { %429 = vmatpush3.bf16.msra.mxu1 %v428_v46 }
  0x55   :  { %430 = vmatprep.subr.bf16.mxu1 %v545_v0 }
  0x56   :  { %408 = vmatpush3.bf16.msra.mxu0 %v407_v45 }
  0x58   :  { %432 = vmatpush3.bf16.msra.mxu1 %v431_v50 }
  0x59   :  { %348 = vmatmul.mubr.f32.vlgmr.msra.gmra.mrb[0].mxu0 %v63_v47 }
 0x12c   :  { %v153_v52 = vpop.f32.mrb[0].mxu0 }
 0x12d   :  { %v154_v53 = vadd.f32 %v278_v51, %v153_v52  ;;  %v349_v54 = vpop.f32.mrb[1].mxu0 }
 0x12f   :  { %383 = vmatmul.mubr.f32.vlgmr.msra.gmra.mrb[0].mxu1 %v154_v53 }
 0x202   :  { %v246_v56 = vpop.f32.mrb[0].mxu1 }
 0x203   :  { %v247_v57 = vadd.f32 %v279_v55, %v246_v56  ;;  %v384_v58 = vpop.f32.mrb[1].mxu1 }
 0x205   :  { %v280_v59 = vmul.f32 -1.442695, %v247_v57 }
 0x207   :  { %442 = vpow2.f32 %v280_v59 }
 0x211   :  { %v443_v60 = vpop.eup %442 }
 0x212   :  { %v253_v61 = vadd.f32 1.0, %v443_v60 }
 0x214   :  { %444 = vrcp.f32 %v253_v61 }
 0x21e   :  { %v445_v62 = vpop.eup %444 }
 0x21f   :  { %v258_v0 = vsub.f32 1.0, %v445_v62  ;;  %v256_v1 = vmul.f32 %v445_v62, %v63_v47 }
 0x221   :  { %v259_v2 = vmul.f32 %v258_v0, %v257_v63 }
 0x223   :  { %v260_v3 = vadd.f32 %v259_v2, %v256_v1 }
 0x225   :  { %261 = vst [vmem:[#allocation8] sm:$0x3] %v260_v3 }
 0x226   :  { %523 = shalt.err (!%p520_p0)
}
 0x227   :  { %s524_s17 = scalar_lea.hbm %s669_s6, 32 }
 0x228   :  { %p525_p1 = scmp.ne.s32.totalorder %s669_s6, %s524_s17  ;;  %p528_p2 = scmp.lt.u32.totalorder %s524_s17, %s669_s6 }
 0x22a   :  { %p530_p3 = pnand %p528_p2, %p525_p1 }
 0x22c   :  { %533 = shalt.err (!%p530_p3)
}
 0x22d   :  { %271 = dma.vmem_to_hbm [thread:$0]  %s269_s14, 32, %s669_s6, [#allocation4]  }
 0x22e   :  { %538 = dma.done.wait [#allocation4], 32  }
 0x22f   :  { %539 = vsyncadd [#allocation4], 4294967264 }
 0x230   :  { %275 = vsyncpa [#allocation3], 1 }
 0x231   :  { %276 = vsyncpa [#allocation6], 1 }
 0x232   :  { %277 = vsyncpa [#allocation4], 1 }

</bundles_post_ra>
